<compile_context>
chip_gen: v5e
topology: v5e:2x2
jax: 0.10.0
libtpu: 0.0.40
codegen_flags: <defaults>
</compile_context>

<pallas_src>
import functools

import jax
import jax.numpy as jnp
from jax.experimental import pallas as pl
from jax.experimental.pallas import tpu as pltpu


def _round_up(x, m):
    return ((x + m - 1) // m) * m


def _head_kernel(x_ref, w_ref, b_ref, box_ref, cls_ref, dir_ref, *, nb, nc):
    """Fused 1x1-conv head tile.

    x_ref : (C, tp)  pixels on lanes
    w_ref : (O, C)   fused [box|cls|dir] weights (VMEM-resident)
    b_ref : (O, 1)   fused bias
    outs  : (nb, tp), (nc, tp), (nd, tp)  — lane-dense stores
    """
    y = jnp.dot(w_ref[...], x_ref[...], preferred_element_type=jnp.float32)
    y = y + b_ref[...]                      # (O, tp), bias broadcast over lanes
    box_ref[...] = y[:nb, :].astype(box_ref.dtype)
    cls_ref[...] = y[nb:nb + nc, :].astype(cls_ref.dtype)
    dir_ref[...] = y[nb + nc:, :].astype(dir_ref.dtype)


@functools.partial(jax.jit, static_argnames=("max_tile",))
def pointpillars_head_forward(x_nchw, params, max_tile=1024):
    """Runs PointPillarsHead.forward.

    Args:
      x_nchw:   (N, C, H, W) float32 feature map (PyTorch layout).
      params:   dict with w_box (num_box, C), b_box (num_box,), w_cls, b_cls,
                w_dir, b_dir — weights in PyTorch Conv2d orientation
                (out_channels, in_channels) (the (O, C, 1, 1) kernel squeezed).
      max_tile: max pixels per tile on the lane axis (multiple of 128).

    Returns:
      (box_preds, cls_preds, dir_preds), each (N, out_ch, H, W) in NCHW.
    """
    N, C, H, W = x_nchw.shape
    HW = H * W

    w_box, b_box = params["w_box"], params["b_box"]
    w_cls, b_cls = params["w_cls"], params["b_cls"]
    w_dir, b_dir = params["w_dir"], params["b_dir"]
    nb, nc, nd = w_box.shape[0], w_cls.shape[0], w_dir.shape[0]
    no = nb + nc + nd

    # Fuse the three heads: one weight (O, C) and one bias (O, 1).
    w_fused = jnp.concatenate([w_box, w_cls, w_dir], axis=0)
    b_fused = jnp.concatenate([b_box, b_cls, b_dir], axis=0).reshape(no, 1)

    # NCHW -> (N, C, H*W): a free reshape, no relayout through HBM.
    x = x_nchw.reshape(N, C, HW)

    # Pixel tile on the lane axis: multiple of 128, as large as sensible.
    tp = min(max_tile, _round_up(HW, 128))
    hwp = _round_up(HW, tp)
    if hwp != HW:  # pad pixel axis so any H, W works with a big tile
        x = jnp.pad(x, ((0, 0), (0, 0), (0, hwp - HW)))

    grid = (N, hwp // tp)

    def x_map(n, p):
        return (n, 0, p)

    def const_map(n, p):
        return (0, 0)

    kernel = functools.partial(_head_kernel, nb=nb, nc=nc)

    box_f, cls_f, dir_f = pl.pallas_call(
        kernel,
        out_shape=(
            jax.ShapeDtypeStruct((N, nb, hwp), x.dtype),
            jax.ShapeDtypeStruct((N, nc, hwp), x.dtype),
            jax.ShapeDtypeStruct((N, nd, hwp), x.dtype),
        ),
        grid_spec=pltpu.PrefetchScalarGridSpec(
            num_scalar_prefetch=0,
            grid=grid,
            in_specs=[
                pl.BlockSpec((None, C, tp), x_map),    # x tile (C, tp)
                pl.BlockSpec((no, C), const_map),      # fused weights, resident
                pl.BlockSpec((no, 1), const_map),      # fused bias, resident
            ],
            out_specs=[
                pl.BlockSpec((None, nb, tp), x_map),
                pl.BlockSpec((None, nc, tp), x_map),
                pl.BlockSpec((None, nd, tp), x_map),
            ],
        ),
        compiler_params=pltpu.CompilerParams(
            dimension_semantics=("parallel", "parallel")),
    )(x, w_fused, b_fused)

    def to_nchw(flat, o):
        if hwp != HW:
            flat = flat[:, :, :HW]
        return flat.reshape(N, o, H, W)   # free reshape

    # DeQuantStub is identity in float mode — nothing to do.
    return to_nchw(box_f, nb), to_nchw(cls_f, nc), to_nchw(dir_f, nd)


def init_pointpillars_head_params(key,
                                  in_channels=32,
                                  num_classes=1,
                                  anchors_num_per_class=2,
                                  num_direction_bins=2,
                                  box_code_size=7,
                                  dtype=jnp.float32):
    """Synthetic init matching the module's parameter shapes.

    Conv2d(in, out, 1) weight (out, in, 1, 1) is stored as (out, in); bias (out,).
    """
    num_anchor_per_loc = num_classes * anchors_num_per_class
    num_cls = num_anchor_per_loc * num_classes
    num_box = num_anchor_per_loc * box_code_size
    num_dir = num_anchor_per_loc * num_direction_bins

    keys = jax.random.split(key, 6)
    bound = 1.0 / float(in_channels) ** 0.5

    def uinit(k, shape):
        return jax.random.uniform(k, shape, dtype, -bound, bound)

    # TODO(synk): use_direction_classifier=False (dir_preds=None) path is not
    # exercised; this implementation always computes the direction head.
    return {
        "w_box": uinit(keys[0], (num_box, in_channels)),
        "b_box": uinit(keys[1], (num_box,)),
        "w_cls": uinit(keys[2], (num_cls, in_channels)),
        "b_cls": uinit(keys[3], (num_cls,)),
        "w_dir": uinit(keys[4], (num_dir, in_channels)),
        "b_dir": uinit(keys[5], (num_dir,)),
    }


if __name__ == "__main__":
    key = jax.random.PRNGKey(0)
    k_x, k_p = jax.random.split(key)

    # Small shapes consistent with the module: batch=2, in_channels=32,
    # spatial 16x16, num_classes=1, anchors_per_class=2, box_code_size=7.
    N, C, H, W = 2, 32, 16, 16
    x = jax.random.normal(k_x, (N, C, H, W), jnp.float32)

    params = init_pointpillars_head_params(k_p, in_channels=C)

    box_preds, cls_preds, dir_preds = pointpillars_head_forward(x, params)
    jax.block_until_ready((box_preds, cls_preds, dir_preds))

    # Reference in plain JAX (1x1 conv == channel matmul in NCHW).
    def ref(w, b):
        return jnp.einsum("oc,nchw->nohw", w, x) + b[None, :, None, None]

    ref_box = ref(params["w_box"], params["b_box"])
    ref_cls = ref(params["w_cls"], params["b_cls"])
    ref_dir = ref(params["w_dir"], params["b_dir"])

    assert box_preds.shape == (N, 14, H, W)
    assert cls_preds.shape == (N, 2, H, W)
    assert dir_preds.shape == (N, 4, H, W)
    assert jnp.allclose(box_preds, ref_box, atol=2e-5, rtol=2e-5)
    assert jnp.allclose(cls_preds, ref_cls, atol=2e-5, rtol=2e-5)
    assert jnp.allclose(dir_preds, ref_dir, atol=2e-5, rtol=2e-5)

    print("KERNEL_OK")
</pallas_src>

<mosaic_0001>
module attributes {stable_mosaic.version = 11 : i64} {
  func.func @_head_kernel(%arg0: i32, %arg1: i32, %arg2: memref<1x32x256xf32, #tpu.memory_space<vmem>>, %arg3: memref<20x32xf32, #tpu.memory_space<vmem>>, %arg4: memref<20x1xf32, #tpu.memory_space<vmem>>, %arg5: memref<1x14x256xf32, #tpu.memory_space<vmem>>, %arg6: memref<1x2x256xf32, #tpu.memory_space<vmem>>, %arg7: memref<1x4x256xf32, #tpu.memory_space<vmem>>) attributes {dimension_semantics = [#tpu.dimension_semantics<parallel>, #tpu.dimension_semantics<parallel>], iteration_bounds = array<i64: 2, 1>, scalar_prefetch = 0 : i64, scratch_operands = 0 : i64, tpu.core_type = #tpu.core_type<tc>, window_params = [{transform_indices = @transform_0, window_bounds = array<i64: 1, 32, 256>}, {pipeline_mode = #tpu.pipeline_mode<synchronous>, transform_indices = @transform_1, window_bounds = array<i64: 20, 32>}, {pipeline_mode = #tpu.pipeline_mode<synchronous>, transform_indices = @transform_2, window_bounds = array<i64: 20, 1>}, {transform_indices = @transform_3, window_bounds = array<i64: 1, 14, 256>}, {transform_indices = @transform_4, window_bounds = array<i64: 1, 2, 256>}, {transform_indices = @transform_5, window_bounds = array<i64: 1, 4, 256>}]} {
    %c0 = arith.constant 0 : index
    %c0_0 = arith.constant 0 : index
    %0 = vector.load %arg3[%c0, %c0_0] : memref<20x32xf32, #tpu.memory_space<vmem>>, vector<20x32xf32>
    %c0_1 = arith.constant 0 : index
    %c0_2 = arith.constant 0 : index
    %c0_3 = arith.constant 0 : index
    %1 = vector.load %arg2[%c0_1, %c0_2, %c0_3] : memref<1x32x256xf32, #tpu.memory_space<vmem>>, vector<1x32x256xf32>
    %2 = vector.shape_cast %1 : vector<1x32x256xf32> to vector<32x256xf32>
    %cst = arith.constant dense<0.000000e+00> : vector<20x256xf32>
    %3 = tpu.matmul %0, %2, %cst {dimension_numbers = #tpu.dot_dimension_numbers<[1], [0], [0], [1], [0, 0, 1, 1], [], []>} : vector<20x32xf32>, vector<32x256xf32>, vector<20x256xf32> -> vector<20x256xf32>
    %c0_4 = arith.constant 0 : index
    %c0_5 = arith.constant 0 : index
    %4 = vector.load %arg4[%c0_4, %c0_5] : memref<20x1xf32, #tpu.memory_space<vmem>>, vector<20x1xf32>
    %5 = vector.broadcast %4 : vector<20x1xf32> to vector<20x256xf32>
    %6 = arith.addf %3, %5 : vector<20x256xf32>
    %7 = vector.extract_strided_slice %6 {offsets = [0, 0], sizes = [14, 256], strides = [1, 1]} : vector<20x256xf32> to vector<14x256xf32>
    %c0_6 = arith.constant 0 : index
    %c0_7 = arith.constant 0 : index
    %c0_8 = arith.constant 0 : index
    %8 = vector.load %arg5[%c0_6, %c0_7, %c0_8] : memref<1x14x256xf32, #tpu.memory_space<vmem>>, vector<1x14x256xf32>
    %9 = vector.shape_cast %8 : vector<1x14x256xf32> to vector<14x256xf32>
    %10 = vector.shape_cast %7 : vector<14x256xf32> to vector<1x14x256xf32>
    tpu.vector_store %arg5[%c0_6, %c0_7, %c0_8], %10 {strides = array<i32>} : memref<1x14x256xf32, #tpu.memory_space<vmem>>, vector<1x14x256xf32>,
    %11 = vector.extract_strided_slice %6 {offsets = [14, 0], sizes = [2, 256], strides = [1, 1]} : vector<20x256xf32> to vector<2x256xf32>
    %c0_9 = arith.constant 0 : index
    %c0_10 = arith.constant 0 : index
    %c0_11 = arith.constant 0 : index
    %12 = vector.load %arg6[%c0_9, %c0_10, %c0_11] : memref<1x2x256xf32, #tpu.memory_space<vmem>>, vector<1x2x256xf32>
    %13 = vector.shape_cast %12 : vector<1x2x256xf32> to vector<2x256xf32>
    %14 = vector.shape_cast %11 : vector<2x256xf32> to vector<1x2x256xf32>
    tpu.vector_store %arg6[%c0_9, %c0_10, %c0_11], %14 {strides = array<i32>} : memref<1x2x256xf32, #tpu.memory_space<vmem>>, vector<1x2x256xf32>,
    %15 = vector.extract_strided_slice %6 {offsets = [16, 0], sizes = [4, 256], strides = [1, 1]} : vector<20x256xf32> to vector<4x256xf32>
    %c0_12 = arith.constant 0 : index
    %c0_13 = arith.constant 0 : index
    %c0_14 = arith.constant 0 : index
    %16 = vector.load %arg7[%c0_12, %c0_13, %c0_14] : memref<1x4x256xf32, #tpu.memory_space<vmem>>, vector<1x4x256xf32>
    %17 = vector.shape_cast %16 : vector<1x4x256xf32> to vector<4x256xf32>
    %18 = vector.shape_cast %15 : vector<4x256xf32> to vector<1x4x256xf32>
    tpu.vector_store %arg7[%c0_12, %c0_13, %c0_14], %18 {strides = array<i32>} : memref<1x4x256xf32, #tpu.memory_space<vmem>>, vector<1x4x256xf32>,
    return
  }
  func.func @transform_0(%arg0: i32, %arg1: i32) -> (i32, i32, i32) {
    %c0_i32 = arith.constant 0 : i32
    %c0_i32_0 = arith.constant 0 : i32
    return %arg0, %c0_i32, %arg1 : i32, i32, i32
  }
  func.func @transform_1(%arg0: i32, %arg1: i32) -> (i32, i32) {
    %c0_i32 = arith.constant 0 : i32
    %c0_i32_0 = arith.constant 0 : i32
    %c0_i32_1 = arith.constant 0 : i32
    return %c0_i32, %c0_i32_0 : i32, i32
  }
  func.func @transform_2(%arg0: i32, %arg1: i32) -> (i32, i32) {
    %c0_i32 = arith.constant 0 : i32
    %c0_i32_0 = arith.constant 0 : i32
    %c0_i32_1 = arith.constant 0 : i32
    return %c0_i32, %c0_i32_0 : i32, i32
  }
  func.func @transform_3(%arg0: i32, %arg1: i32) -> (i32, i32, i32) {
    %c0_i32 = arith.constant 0 : i32
    %c0_i32_0 = arith.constant 0 : i32
    return %arg0, %c0_i32, %arg1 : i32, i32, i32
  }
  func.func @transform_4(%arg0: i32, %arg1: i32) -> (i32, i32, i32) {
    %c0_i32 = arith.constant 0 : i32
    %c0_i32_0 = arith.constant 0 : i32
    return %arg0, %c0_i32, %arg1 : i32, i32, i32
  }
  func.func @transform_5(%arg0: i32, %arg1: i32) -> (i32, i32, i32) {
    %c0_i32 = arith.constant 0 : i32
    %c0_i32_0 = arith.constant 0 : i32
    return %arg0, %c0_i32, %arg1 : i32, i32, i32
  }
}

</mosaic_0001>

<bundles_post_ra>
// kernel: pointpillars_head_forward.1
= control target key start
LH: loop header
LB: loop body
LE: loop exit
PB: predicated region body
PF: predicated region fallthrough
CT: control target
= control target key end

     0   :  { %s723_s18 = smov 0   ;;  %s725_s19 = smov 0   ;;  %s792_s0 = inlined_call_operand.vmem [shape: f32[2,32,256], index: 0, kind: input, shape index: {}]   ;;  %s793_s1 = inlined_call_operand.vmem [shape: f32[20,32], index: 1, kind: input, shape index: {}]   ;;  %s794_s2 = inlined_call_operand.vmem [shape: f32[20,1], index: 2, kind: input, shape index: {}]   ;;  %s795_s3 = inlined_call_operand.vmem [shape: f32[2,14,256], index: 3, kind: output, shape index: {0}]   ;;  %s796_s4 = inlined_call_operand.vmem [shape: f32[2,2,256], index: 4, kind: output, shape index: {1}]   ;;  %s797_s5 = inlined_call_operand.vmem [shape: f32[2,4,256], index: 5, kind: output, shape index: {2}]  }
   0x1   :  { %s727_s20 = smov 0  }
   0x2 LB: > { %s28_s21 = sadd.s32 1, %s686_s19  ;;  %p612_p0 = scmp.ge.s32.totalorder %s690_s20, 1  ;;  %s690_s20 = sphi %s727_s20, %s16_s20   ;;  %s686_s19 = sphi %s725_s19, %s799_s19   ;;  %s682_s18 = sphi %s723_s18, %s798_s18  }
   0x3   : > { %p30_p1 = scmp.ge.s32.totalorder %s28_s21, 2  ;;  %p217_p2 = scmp.lt.s32.totalorder %s690_s20, 3 }
   0x5   : > { %s801_s21 = smov (%p30_p1, %s28_s21), 0  ;;  %p218_p3 = pnand %p612_p0, %p217_p2 }
   0x6   : > { %p272_p4 = scmp.lt.s32.totalorder (!%p218_p3), %s682_s18, 1 }
   0x7   : > { %221 = sbr.rel (%p218_p3) target bundleno = 170 (0xaa), region = 32 }
   0xc   : > { %v692_v0 = vmov 0   ;;  %v323_v1 = vld [vmem:[%s794_s2 + $0x8] sm:$0xff]  ;;  %s803_s18 = smov (!%p272_p4, %s682_s18), 1  ;;  %v322_v2 = vld [vmem:[%s794_s2] sm:$0xff]  ;;  %vm340_vm0 = vcmask 261120   ;;  %vm417_vm1 = vcmask 1043456  }
   0xd   : > { %666 = vset.pattern.permute.xlu0 %v692_v0  ;;  %667 = vset.pattern.permute.xlu1 %v692_v0  ;;  %s629_s26 = sshll.u32 %s803_s18, 6  ;;  %v312_v11 = vld [vmem:[%s793_s1 + $0x8] sm:$0xff]  ;;  %v324_v12 = vld [vmem:[%s794_s2 + $0x10] sm:$0xf]  ;;  %v311_v13 = vld [vmem:[%s793_s1] sm:$0xff]  ;;  %s630_s13 = sshll.u32 %s803_s18, 5 }
   0xe   : > { %332 = vperm.xlu0 %666, %v323_v1   ;;  %327 = vperm.xlu1 %667, %v322_v2   ;;  %s279_s29 = scalar_lea.vmem %s792_s0, %s629_s26  ;;  %v313_v14 = vld [vmem:[%s793_s1 + $0x10] sm:$0xf]  ;;  %s289_s16 = scalar_lea.vmem %s795_s3, %s630_s13 }
   0xf   : > { %v320_v3 = vld [vmem:[%s279_s29 + $0x30] sm:$0xff]  ;;  %v321_v4 = vld [vmem:[%s279_s29 + $0x38] sm:$0xff]  ;;  %v318_v5 = vld [vmem:[%s279_s29 + $0x20] sm:$0xff]  ;;  %s631_s17 = sshll.u32 %s803_s18, 2  ;;  %s632_s22 = sshll.u32 %s803_s18, 3 }
  0x10   : > { %633 = vmatpush.msra.mxu2 %v320_v3  ;;  %637 = vmatpush.msra.mxu3 %v321_v4  ;;  %v319_v6 = vld [vmem:[%s279_s29 + $0x28] sm:$0xff]  ;;  %v316_v7 = vld [vmem:[%s279_s29 + $0x10] sm:$0xff]  ;;  %v317_v8 = vld [vmem:[%s279_s29 + $0x18] sm:$0xff]  ;;  %s299_s25 = scalar_lea.vmem %s796_s4, %s631_s17  ;;  %s309_s28 = scalar_lea.vmem %s797_s5, %s632_s22 }
  0x11   : > { %362 = vmatpush.msra.mxu0 %v320_v3  ;;  %388 = vmatpush.msra.mxu1 %v321_v4  ;;  %v314_v9 = vld [vmem:[%s279_s29] sm:$0xff]  ;;  %v315_v10 = vld [vmem:[%s279_s29 + $0x8] sm:$0xff] }
  0x12   : > { %634 = vmatpush.msra.mxu2 %v318_v5  ;;  %638 = vmatpush.msra.mxu3 %v319_v6 }
  0x13   : > { %363 = vmatpush.msra.mxu0 %v318_v5  ;;  %389 = vmatpush.msra.mxu1 %v319_v6 }
  0x14   : > { %635 = vmatpush.msra.mxu2 %v316_v7  ;;  %639 = vmatpush.msra.mxu3 %v317_v8 }
  0x15   : > { %364 = vmatpush.msra.mxu0 %v316_v7  ;;  %390 = vmatpush.msra.mxu1 %v317_v8 }
  0x16   : > { %636 = vmatpush.msra.mxu2 %v314_v9  ;;  %640 = vmatpush.msra.mxu3 %v315_v10 }
  0x17   : > { %622 = vmatmul.msk.f32.vlgmr.msra.gmra.mxu2 %vm340_vm0, %v312_v11  ;;  %625 = vmatmul.msk.f32.vlgmr.msra.gmra.mxu3 %vm340_vm0, %v312_v11 }
  0x18   : > { %365 = vmatpush.msra.mxu0 %v314_v9  ;;  %391 = vmatpush.msra.mxu1 %v315_v10 }
  0x19   : > { %337 = vperm.xlu0 %666, %v324_v12   ;;  %621 = vmatmul.msk.f32.vlgmr.msra.gmra.mxu0 %vm340_vm0, %v311_v13 }
  0x1a   : > { %624 = vmatmul.msk.f32.vlgmr.msra.gmra.mxu1 %vm340_vm0, %v311_v13 }
  0x1f   : > { %623 = vmatmul.msk.f32.gmra.mxu2 %vm340_vm0, %v313_v14  ;;  %626 = vmatmul.msk.f32.gmra.mxu3 %vm340_vm0, %v313_v14 }
  0x80   : > { %v328_v15 = vpop.permute.xlu1 %327  ;;  %v333_v17 = vpop.permute.xlu0 %332 }
  0x8b   : > { %v338_v25 = vpop.permute.xlu0 %337 }
  0x96   : > { %v367_v16 = vpop.f32.mrf.mxu0 }
  0x97   : > { %v368_v18 = vadd.f32 %v367_v16, %v328_v15  ;;  %v393_v19 = vpop.f32.mrf.mxu1 }
  0x98   : > { %v394_v20 = vadd.f32 %v393_v19, %v328_v15 }
  0x99   : > { %402 = vst [vmem:[%s289_s16] sm:$0xff] %v368_v18 }
  0x9a   : > { %v370_v21 = vpop.f32.mrf.mxu2  ;;  %v396_v22 = vpop.f32.mrf.mxu3  ;;  %403 = vst [vmem:[%s289_s16 + $0x8] sm:$0xff] %v394_v20 }
  0x9b   : > { %v371_v23 = vadd.f32 %v370_v21, %v333_v17  ;;  %v397_v24 = vadd.f32 %v396_v22, %v333_v17 }
  0x9d   : > { %404 = vst [vmem:[%s289_s16 + $0x10] sm:$0x3f] %v371_v23 }
  0x9e   : > { %408 = vst.sshfl [vmem:[#allocation1] sm:$0xff pattern:$0x73625140] %v371_v23 }
  0x9f   : > { %405 = vst [vmem:[%s289_s16 + $0x18] sm:$0x3f] %v397_v24 }
  0xa0   : > { %409 = vst.sshfl [vmem:[#allocation1 + $0x8] sm:$0xff pattern:$0x73625140] %v397_v24 }
  0xa2   : > { %v373_v26 = vpop.f32.mrf.mxu2  ;;  %v399_v27 = vpop.f32.mrf.mxu3 }
  0xa3   : > { %v400_v28 = vadd.f32 %v399_v27, %v338_v25  ;;  %v374_v29 = vadd.f32 %v373_v26, %v338_v25 }
  0xa5   : > { %v416_v30 = vrot.slane %v400_v28, 4 }
  0xa7   : > { %v411_v31 = vld [vmem:[#allocation1 + $0x3] ss:$4 sm:$0xff]  ;;  %v418_v32 = vsel %vm417_vm1, %v374_v29, %v416_v30 }
  0xa8   : > { %413 = vst [vmem:[%s299_s25] sm:$0xf] %v411_v31 }
  0xa9   : > { %420 = vst [vmem:[%s309_s28] sm:$0xff] %v418_v32 }
  0xaa PF: > { %s16_s20 = sadd.s32 1, %s690_s20   ;;  %s798_s18 = smov %s686_s19 }
  0xab   : > { %p13_p5 = scmp.ge.s32.totalorder %s16_s20, 4   ;;  %s799_s19 = smov %s801_s21 }
  0xad   :  { %15 = sbr.rel (!%p13_p5) target bundleno = 2 (0x2), region = 87 }

</bundles_post_ra>
